<compile_context>
chip_gen: v7x
topology: tpu7x:2x2x1
jax: 0.10.0
libtpu: 0.0.40
codegen_flags: <defaults>
</compile_context>

<pallas_src>
import functools

import jax
import jax.numpy as jnp
import numpy as np
from jax import lax
from jax.experimental import pallas as pl
from jax.experimental.pallas import tpu as pltpu


def _softplus_neg(x):
    # softplus(-x), numerically stable:  max(-x, 0) + log(1 + exp(-|x|))
    return jnp.maximum(-x, 0.0) + jnp.log(1.0 + jnp.exp(-jnp.abs(x)))


def _multi_level_loss_kernel(
    pred_ref,    # [6, HW]   rows: off0, off1, off2, photon, background, count_logits
    tgt_ref,     # [6, HW]   rows: loc0, loc1, loc2, photon_t, background_t, count_target
    dens_ref,    # [1, HW]   density pixel weight  (1 + 2 * box5(target))
    qmat_ref,    # [K_pad,8] augmented fg coords   (-2y, -2x, y^2+x^2+pen, 1, 0..)
    pmat_ref,    # [8, HW]   augmented pixel coords ( y;  x; 1; y^2+x^2; 0..)
    out_ref,     # [1, 128]  per-batch partial sums in lanes 0..4
    *, TP, NP, pos_weight,
):
    f32 = jnp.float32

    # ---------------- masked SSE terms (lane-dense, single pass) ------------
    t_cnt = tgt_ref[pl.ds(5, 1), :].astype(f32)            # [1, HW] count target
    fg = (t_cnt > 0.5).astype(f32)
    mask_sum = jnp.sum(fg)
    has_fg = mask_sum > 0.0

    d = pred_ref[pl.ds(0, 5), :].astype(f32) - tgt_ref[pl.ds(0, 5), :].astype(f32)
    sq = d * d                                             # [5, HW]
    loc_num = jnp.sum(sq[0:3] * fg)
    ph_num = jnp.sum(sq[3:4] * fg)
    bg_num = jnp.sum(sq[4:5])

    qmat = qmat_ref[...].astype(f32)                       # [K_pad, 8]

    # -------- count loss: BCE * (0.6*distance_w + 0.4*density_w), p-chunked --
    def p_chunk(j, carry):
        dist_acc, dens_acc = carry
        j0 = pl.multiple_of(j * TP, TP)

        x = pred_ref[pl.ds(5, 1), pl.ds(j0, TP)].astype(f32)   # [1, TP] logits
        t = tgt_ref[pl.ds(5, 1), pl.ds(j0, TP)].astype(f32)
        sp = _softplus_neg(x)                                  # softplus(-x)
        bce = pos_weight * t * sp + (1.0 - t) * (x + sp)       # [1, TP]

        dens_acc = dens_acc + jnp.sum(bce * dens_ref[:, pl.ds(j0, TP)].astype(f32))

        # d2[k, p] = (yk - yp)^2 + (xk - xp)^2 + pen_k   (one MXU matmul)
        pm = pmat_ref[:, pl.ds(j0, TP)].astype(f32)            # [8, TP]
        d2 = jnp.dot(qmat, pm, preferred_element_type=f32,
                     precision=lax.Precision.HIGHEST)          # [K_pad, TP]
        mind = jnp.sqrt(jnp.min(d2, axis=0, keepdims=True))    # [1, TP]
        dist_w = jnp.where(has_fg, jnp.exp(mind * f32(-0.2)), f32(1.0))
        dist_acc = dist_acc + jnp.sum(bce * dist_w)
        return dist_acc, dens_acc

    zero = jnp.zeros((), f32)
    dist_term, dens_term = lax.fori_loop(0, NP, p_chunk, (zero, zero),
                                         unroll=(NP <= 8))
    count_sum = 0.6 * dist_term + 0.4 * dens_term          # adaptive pixel weights

    # ---------------- write per-batch partial sums --------------------------
    lane = lax.broadcasted_iota(jnp.int32, (1, 128), 1)
    zeros128 = jnp.zeros((1, 128), f32)
    out_ref[...] = (jnp.where(lane == 0, count_sum, zeros128)
                    + jnp.where(lane == 1, mask_sum, zeros128)
                    + jnp.where(lane == 2, loc_num, zeros128)
                    + jnp.where(lane == 3, ph_num, zeros128)
                    + jnp.where(lane == 4, bg_num, zeros128))


def multi_level_loss(outputs, targets, loss_weights=None, count_pos_weight=2.0,
                     max_foreground=None):
    """JAX/Pallas equivalent of MultiLevelLoss.forward (pixel_weight_strategy='adaptive')."""
    lw = loss_weights or {'count': 1.0, 'localization': 1.0,
                          'photon': 0.5, 'background': 0.1}
    f32 = jnp.float32

    prob = outputs['prob']
    B, _, H, W = prob.shape
    HW = H * W

    tgt_img = targets['count_maps'][:, 0].astype(f32)        # [B, H, W]

    # --- channel-stacked, lane-dense flat inputs (fewer, larger DMAs) --------
    pred_stack = jnp.concatenate(
        [outputs['offset'], outputs['photon'][:, 0:1],
         outputs['background'][:, 0:1], outputs['prob'][:, 0:1]],
        axis=1).reshape(B, 6, HW)
    tgt_stack = jnp.concatenate(
        [targets['loc_maps'][:, 0:3], targets['photon_maps'][:, 0:1],
         targets['background_maps'][:, 0:1], targets['count_maps'][:, 0:1]],
        axis=1).reshape(B, 6, HW)

    # --- density pixel weight: 5x5 box conv on the target (O(HW) JAX prep) ---
    pad = jnp.pad(tgt_img, ((0, 0), (2, 2), (2, 2)))
    dens = sum(pad[:, di:di + H, dj:dj + W]
               for di in range(5) for dj in range(5)) * (1.0 / 25.0)
    dens_w = (1.0 + 2.0 * dens).reshape(B, 1, HW)

    # --- foreground gather: distance min runs over K fg pixels, not HW -------
    tgt_flat = tgt_img.reshape(B, HW)
    fg = tgt_flat > 0.5
    if max_foreground is None:
        # Concrete per-batch max fg count (wrapper is not jitted here).
        # TODO(synk): pass max_foreground explicitly when calling under jit.
        k_act = int(jnp.max(jnp.sum(fg, axis=1)))
    else:
        k_act = int(max_foreground)
    k_pad = min(max(8, -(-max(k_act, 1) // 8) * 8), HW)

    vals, idx = lax.top_k(fg.astype(f32), k_pad)             # [B, k_pad]
    yq = (idx // W).astype(f32)
    xq = (idx % W).astype(f32)
    pen = jnp.where(vals > 0.5, f32(0.0), f32(1e30))         # padded/bg rows -> huge d2
    ones_q = jnp.ones_like(yq)
    zeros_q = jnp.zeros_like(yq)
    qmat = jnp.stack([-2.0 * yq, -2.0 * xq, yq * yq + xq * xq + pen, ones_q,
                      zeros_q, zeros_q, zeros_q, zeros_q], axis=-1)   # [B, k_pad, 8]

    p_idx = jnp.arange(HW, dtype=jnp.int32)
    yp = (p_idx // W).astype(f32)
    xp = (p_idx % W).astype(f32)
    ones_p = jnp.ones_like(yp)
    zeros_p = jnp.zeros_like(yp)
    pmat = jnp.stack([yp, xp, ones_p, yp * yp + xp * xp,
                      zeros_p, zeros_p, zeros_p, zeros_p], axis=0)    # [8, HW]

    # --- p-chunk size: keep the [k_pad, TP] distance tile around 2 MiB -------
    tp = HW
    tile_budget = 2 << 20
    if k_pad * HW * 4 > tile_budget:
        best = None
        cand = 128
        while cand < HW:
            if HW % cand == 0 and k_pad * cand * 4 <= tile_budget:
                best = cand
            cand += 128
        if best is not None:
            tp = best
    np_chunks = HW // tp

    # --- VMEM budget, per-generation cap (v7x has only 64 MiB) ---------------
    try:
        vmem_cap = pltpu.get_tpu_info().vmem_capacity_bytes
    except Exception:
        vmem_cap = 64 * 2**20
    in_bytes = 4 * (2 * 6 * HW + HW + k_pad * 8 + 8 * HW)
    work_bytes = 4 * (k_pad * tp + 24 * tp + 8 * HW)
    need = 2 * in_bytes + work_bytes + (2 << 20)
    vmem_limit = int(min(int(0.75 * vmem_cap), max(need, 16 * 2**20)))

    kernel = functools.partial(_multi_level_loss_kernel, TP=tp, NP=np_chunks,
                               pos_weight=float(count_pos_weight))

    parts = pl.pallas_call(
        kernel,
        out_shape=jax.ShapeDtypeStruct((B, 1, 128), jnp.float32),
        grid=(B,),
        in_specs=[
            pl.BlockSpec((None, 6, HW), lambda b: (b, 0, 0)),      # pred_stack
            pl.BlockSpec((None, 6, HW), lambda b: (b, 0, 0)),      # tgt_stack
            pl.BlockSpec((None, 1, HW), lambda b: (b, 0, 0)),      # dens_w
            pl.BlockSpec((None, k_pad, 8), lambda b: (b, 0, 0)),   # qmat
            pl.BlockSpec((8, HW), lambda b: (0, 0)),               # pmat (shared)
        ],
        out_specs=pl.BlockSpec((None, 1, 128), lambda b: (b, 0, 0)),
        compiler_params=pltpu.CompilerParams(
            dimension_semantics=("parallel",),
            vmem_limit_bytes=vmem_limit),
    )(pred_stack, tgt_stack, dens_w, qmat, pmat)

    # --- tiny scalar epilogue (plain JAX) combining per-batch partial sums ---
    parts = parts[:, 0, :]
    count_sum = jnp.sum(parts[:, 0])
    mask_sum = jnp.sum(parts[:, 1])
    loc_num = jnp.sum(parts[:, 2])
    ph_num = jnp.sum(parts[:, 3])
    bg_num = jnp.sum(parts[:, 4])

    denom = jnp.float32(B * HW)
    count_loss = count_sum / denom
    # PyTorch reference returns 0 on NaN/Inf in the count loss.
    count_loss = jnp.where(jnp.isfinite(count_loss), count_loss, jnp.float32(0.0))
    loc_loss = jnp.where(mask_sum > 0.0,
                         loc_num / jnp.maximum(3.0 * mask_sum, 1.0),
                         jnp.float32(0.0))
    ph_loss = jnp.where(mask_sum > 0.0,
                        ph_num / jnp.maximum(mask_sum, 1.0),
                        jnp.float32(0.0))
    bg_loss = bg_num / denom
    total = (lw['count'] * count_loss + lw['localization'] * loc_loss
             + lw['photon'] * ph_loss + lw['background'] * bg_loss)

    return {'count': count_loss, 'localization': loc_loss, 'photon': ph_loss,
            'background': bg_loss, 'total': total}


# ----------------------------- pure-JAX reference ----------------------------
def _reference(outputs, targets, lw, pos_weight=2.0):
    prob = outputs['prob']
    B, _, H, W = prob.shape
    HW = H * W
    t = targets['count_maps'][:, 0:1].astype(jnp.float32)
    x = prob.astype(jnp.float32)

    bce = pos_weight * t * jax.nn.softplus(-x) + (1.0 - t) * jax.nn.softplus(x)

    pad = jnp.pad(t, ((0, 0), (0, 0), (2, 2), (2, 2)))
    dens = sum(pad[:, :, di:di + H, dj:dj + W]
               for di in range(5) for dj in range(5)) / 25.0
    dens_w = 1.0 + 2.0 * dens

    ys, xs = jnp.meshgrid(jnp.arange(H), jnp.arange(W), indexing='ij')
    coords = jnp.stack([ys, xs], -1).reshape(HW, 2).astype(jnp.float32)
    d = jnp.sqrt(((coords[:, None, :] - coords[None, :, :]) ** 2).sum(-1))
    tf = t.reshape(B, HW)
    fg = tf > 0.5
    masked = jnp.where(fg[:, None, :], d[None], 1e30)
    mind = masked.min(-1)
    dist_w = jnp.where(fg.any(-1, keepdims=True),
                       jnp.exp(-mind / 5.0), 1.0).reshape(B, 1, H, W)
    pix_w = 0.6 * dist_w + 0.4 * dens_w
    count = jnp.mean(bce * pix_w)

    mask = (targets['count_maps'][:, 0:1] > 0.5).astype(jnp.float32)
    mask3 = jnp.broadcast_to(mask, (B, 3, H, W))
    msum = mask.sum()
    dloc = (outputs['offset'] - targets['loc_maps'][:, 0:3]) ** 2
    loc = jnp.where(msum > 0, (dloc * mask3).sum() / jnp.maximum(3 * msum, 1.0), 0.0)
    dph = (outputs['photon'] - targets['photon_maps'][:, 0:1]) ** 2
    ph = jnp.where(msum > 0, (dph * mask).sum() / jnp.maximum(msum, 1.0), 0.0)
    bg = jnp.mean((outputs['background'] - targets['background_maps'][:, 0:1]) ** 2)
    total = (lw['count'] * count + lw['localization'] * loc
             + lw['photon'] * ph + lw['background'] * bg)
    return jnp.stack([count, loc, ph, bg, total])


if __name__ == "__main__":
    B, H, W = 2, 16, 16
    key = jax.random.PRNGKey(0)
    ks = jax.random.split(key, 8)

    outputs = {
        'prob': jax.random.normal(ks[0], (B, 1, H, W), jnp.float32),
        'offset': jax.random.normal(ks[1], (B, 3, H, W), jnp.float32),
        'photon': jax.random.uniform(ks[2], (B, 1, H, W), jnp.float32),
        'background': jax.random.uniform(ks[3], (B, 1, H, W), jnp.float32),
    }
    count0 = (jax.random.uniform(ks[4], (B, 1, H, W)) > 0.9).astype(jnp.float32)
    targets = {
        'count_maps': jnp.concatenate([count0, jnp.zeros_like(count0)], axis=1),
        'loc_maps': jax.random.normal(ks[5], (B, 3, H, W), jnp.float32),
        'photon_maps': jax.random.uniform(ks[6], (B, 1, H, W), jnp.float32),
        'background_maps': jax.random.uniform(ks[7], (B, 1, H, W), jnp.float32),
    }

    losses = multi_level_loss(outputs, targets)
    jax.block_until_ready(losses['total'])

    lw = {'count': 1.0, 'localization': 1.0, 'photon': 0.5, 'background': 0.1}
    ref = np.asarray(_reference(outputs, targets, lw))
    got = np.asarray(jnp.stack([losses['count'], losses['localization'],
                                losses['photon'], losses['background'],
                                losses['total']]))
    np.testing.assert_allclose(got, ref, rtol=1e-3, atol=1e-5)

    print("KERNEL_OK")
</pallas_src>

<mosaic_0001>
module attributes {stable_mosaic.version = 11 : i64} {
  func.func @_multi_level_loss_kernel(%arg0: i32, %arg1: memref<1x6x256xf32, #tpu.memory_space<vmem>>, %arg2: memref<1x6x256xf32, #tpu.memory_space<vmem>>, %arg3: memref<1x1x256xf32, #tpu.memory_space<vmem>>, %arg4: memref<1x24x8xf32, #tpu.memory_space<vmem>>, %arg5: memref<8x256xf32, #tpu.memory_space<vmem>>, %arg6: memref<1x1x128xf32, #tpu.memory_space<vmem>>) attributes {dimension_semantics = [#tpu.dimension_semantics<parallel>], iteration_bounds = array<i64: 2>, scalar_prefetch = 0 : i64, scratch_operands = 0 : i64, tpu.core_type = #tpu.core_type<tc>, window_params = [{transform_indices = @transform_0, window_bounds = array<i64: 1, 6, 256>}, {transform_indices = @transform_1, window_bounds = array<i64: 1, 6, 256>}, {transform_indices = @transform_2, window_bounds = array<i64: 1, 1, 256>}, {transform_indices = @transform_3, window_bounds = array<i64: 1, 24, 8>}, {pipeline_mode = #tpu.pipeline_mode<synchronous>, transform_indices = @transform_4, window_bounds = array<i64: 8, 256>}, {transform_indices = @transform_5, window_bounds = array<i64: 1, 1, 128>}]} {
    %c0 = arith.constant 0 : index
    %c5 = arith.constant 5 : index
    %c0_0 = arith.constant 0 : index
    %0 = vector.load %arg2[%c0, %c5, %c0_0] : memref<1x6x256xf32, #tpu.memory_space<vmem>>, vector<1x1x256xf32>
    %1 = vector.shape_cast %0 : vector<1x1x256xf32> to vector<1x256xf32>
    %cst = arith.constant 5.000000e-01 : f32
    %2 = vector.broadcast %cst : f32 to vector<1x256xf32>
    %3 = arith.cmpf ogt, %1, %2 : vector<1x256xf32>
    %4 = arith.extui %3 : vector<1x256xi1> to vector<1x256xi32>
    %5 = arith.sitofp %4 : vector<1x256xi32> to vector<1x256xf32>
    %6 = vector.shape_cast %5 : vector<1x256xf32> to vector<1x1x256xf32>
    %cst_1 = arith.constant dense<0.000000e+00> : vector<1xf32>
    %7 = vector.multi_reduction <add>, %6, %cst_1 [1, 2] : vector<1x1x256xf32> to vector<1xf32>
    %8 = vector.shape_cast %7 : vector<1xf32> to vector<1x1x1xf32>
    %9 = vector.extract %8[0, 0, 0] : f32 from vector<1x1x1xf32>
    %cst_2 = arith.constant 0.000000e+00 : f32
    %10 = arith.cmpf ogt, %9, %cst_2 : f32
    %c0_3 = arith.constant 0 : index
    %c0_4 = arith.constant 0 : index
    %c0_5 = arith.constant 0 : index
    %11 = vector.load %arg1[%c0_3, %c0_4, %c0_5] : memref<1x6x256xf32, #tpu.memory_space<vmem>>, vector<1x5x256xf32>
    %12 = vector.shape_cast %11 : vector<1x5x256xf32> to vector<5x256xf32>
    %c0_6 = arith.constant 0 : index
    %c0_7 = arith.constant 0 : index
    %c0_8 = arith.constant 0 : index
    %13 = vector.load %arg2[%c0_6, %c0_7, %c0_8] : memref<1x6x256xf32, #tpu.memory_space<vmem>>, vector<1x5x256xf32>
    %14 = vector.shape_cast %13 : vector<1x5x256xf32> to vector<5x256xf32>
    %15 = arith.subf %12, %14 : vector<5x256xf32>
    %16 = arith.mulf %15, %15 : vector<5x256xf32>
    %17 = vector.extract_strided_slice %16 {offsets = [0, 0], sizes = [3, 256], strides = [1, 1]} : vector<5x256xf32> to vector<3x256xf32>
    %18 = vector.broadcast %5 : vector<1x256xf32> to vector<3x256xf32>
    %19 = arith.mulf %17, %18 : vector<3x256xf32>
    %20 = vector.shape_cast %19 : vector<3x256xf32> to vector<1x3x256xf32>
    %cst_9 = arith.constant dense<0.000000e+00> : vector<1xf32>
    %21 = vector.multi_reduction <add>, %20, %cst_9 [1, 2] : vector<1x3x256xf32> to vector<1xf32>
    %22 = vector.shape_cast %21 : vector<1xf32> to vector<1x1x1xf32>
    %23 = vector.extract %22[0, 0, 0] : f32 from vector<1x1x1xf32>
    %24 = vector.extract_strided_slice %16 {offsets = [3, 0], sizes = [1, 256], strides = [1, 1]} : vector<5x256xf32> to vector<1x256xf32>
    %25 = arith.mulf %24, %5 : vector<1x256xf32>
    %26 = vector.shape_cast %25 : vector<1x256xf32> to vector<1x1x256xf32>
    %cst_10 = arith.constant dense<0.000000e+00> : vector<1xf32>
    %27 = vector.multi_reduction <add>, %26, %cst_10 [1, 2] : vector<1x1x256xf32> to vector<1xf32>
    %28 = vector.shape_cast %27 : vector<1xf32> to vector<1x1x1xf32>
    %29 = vector.extract %28[0, 0, 0] : f32 from vector<1x1x1xf32>
    %30 = vector.extract_strided_slice %16 {offsets = [4, 0], sizes = [1, 256], strides = [1, 1]} : vector<5x256xf32> to vector<1x256xf32>
    %31 = vector.shape_cast %30 : vector<1x256xf32> to vector<1x1x256xf32>
    %cst_11 = arith.constant dense<0.000000e+00> : vector<1xf32>
    %32 = vector.multi_reduction <add>, %31, %cst_11 [1, 2] : vector<1x1x256xf32> to vector<1xf32>
    %33 = vector.shape_cast %32 : vector<1xf32> to vector<1x1x1xf32>
    %34 = vector.extract %33[0, 0, 0] : f32 from vector<1x1x1xf32>
    %c0_12 = arith.constant 0 : index
    %c0_13 = arith.constant 0 : index
    %c0_14 = arith.constant 0 : index
    %35 = vector.load %arg4[%c0_12, %c0_13, %c0_14] : memref<1x24x8xf32, #tpu.memory_space<vmem>>, vector<1x24x8xf32>
    %36 = vector.shape_cast %35 : vector<1x24x8xf32> to vector<24x8xf32>
    %cst_15 = arith.constant 0.000000e+00 : f32
    %cst_16 = arith.constant 0.000000e+00 : f32
    %c0_i32 = arith.constant 0 : i32
    %c256_i32 = arith.constant 256 : i32
    %37 = arith.muli %c0_i32, %c256_i32 : i32
    %38 = tpu.assume_multiple %37, 256 : i32
    %c0_17 = arith.constant 0 : index
    %c5_18 = arith.constant 5 : index
    %39 = arith.index_cast %38 : i32 to index
    %40 = vector.load %arg1[%c0_17, %c5_18, %39] : memref<1x6x256xf32, #tpu.memory_space<vmem>>, vector<1x1x256xf32>
    %41 = vector.shape_cast %40 : vector<1x1x256xf32> to vector<1x256xf32>
    %c0_19 = arith.constant 0 : index
    %c5_20 = arith.constant 5 : index
    %42 = arith.index_cast %38 : i32 to index
    %43 = vector.load %arg2[%c0_19, %c5_20, %42] : memref<1x6x256xf32, #tpu.memory_space<vmem>>, vector<1x1x256xf32>
    %44 = vector.shape_cast %43 : vector<1x1x256xf32> to vector<1x256xf32>
    %cst_21 = arith.constant 0.000000e+00 : f32
    %45 = vector.broadcast %cst_21 : f32 to vector<1x256xf32>
    %46 = arith.subf %45, %41 : vector<1x256xf32>
    %cst_22 = arith.constant 0.000000e+00 : f32
    %47 = vector.broadcast %cst_22 : f32 to vector<1x256xf32>
    %48 = arith.maximumf %46, %47 : vector<1x256xf32>
    %49 = math.absf %41 : vector<1x256xf32>
    %cst_23 = arith.constant 0.000000e+00 : f32
    %50 = vector.broadcast %cst_23 : f32 to vector<1x256xf32>
    %51 = arith.subf %50, %49 : vector<1x256xf32>
    %52 = math.exp %51 : vector<1x256xf32>
    %cst_24 = arith.constant 1.000000e+00 : f32
    %53 = vector.broadcast %cst_24 : f32 to vector<1x256xf32>
    %54 = arith.addf %53, %52 : vector<1x256xf32>
    %55 = math.log %54 : vector<1x256xf32>
    %56 = arith.addf %48, %55 : vector<1x256xf32>
    %cst_25 = arith.constant 2.000000e+00 : f32
    %57 = vector.broadcast %cst_25 : f32 to vector<1x256xf32>
    %58 = arith.mulf %57, %44 : vector<1x256xf32>
    %59 = arith.mulf %58, %56 : vector<1x256xf32>
    %cst_26 = arith.constant 1.000000e+00 : f32
    %60 = vector.broadcast %cst_26 : f32 to vector<1x256xf32>
    %61 = arith.subf %60, %44 : vector<1x256xf32>
    %62 = arith.addf %41, %56 : vector<1x256xf32>
    %63 = arith.mulf %61, %62 : vector<1x256xf32>
    %64 = arith.addf %59, %63 : vector<1x256xf32>
    %c0_27 = arith.constant 0 : index
    %c0_28 = arith.constant 0 : index
    %65 = arith.index_cast %38 : i32 to index
    %66 = vector.load %arg3[%c0_27, %c0_28, %65] : memref<1x1x256xf32, #tpu.memory_space<vmem>>, vector<1x1x256xf32>
    %67 = vector.shape_cast %66 : vector<1x1x256xf32> to vector<1x256xf32>
    %68 = arith.mulf %64, %67 : vector<1x256xf32>
    %69 = vector.shape_cast %68 : vector<1x256xf32> to vector<1x1x256xf32>
    %cst_29 = arith.constant dense<0.000000e+00> : vector<1xf32>
    %70 = vector.multi_reduction <add>, %69, %cst_29 [1, 2] : vector<1x1x256xf32> to vector<1xf32>
    %71 = vector.shape_cast %70 : vector<1xf32> to vector<1x1x1xf32>
    %72 = vector.extract %71[0, 0, 0] : f32 from vector<1x1x1xf32>
    %73 = arith.addf %cst_16, %72 : f32
    %c0_30 = arith.constant 0 : index
    %74 = arith.index_cast %38 : i32 to index
    %75 = vector.load %arg5[%c0_30, %74] : memref<8x256xf32, #tpu.memory_space<vmem>>, vector<8x256xf32>
    %cst_31 = arith.constant dense<0.000000e+00> : vector<24x256xf32>
    %76 = tpu.matmul %36, %75, %cst_31 {dimension_numbers = #tpu.dot_dimension_numbers<[1], [0], [0], [1], [0, 0, 1, 1], [], []>, precision = #tpu.contract_precision<fp32>} : vector<24x8xf32>, vector<8x256xf32>, vector<24x256xf32> -> vector<24x256xf32>
    %cst_32 = arith.constant dense<0x7F800000> : vector<256xf32>
    %77 = vector.multi_reduction <minimumf>, %76, %cst_32 [0] : vector<24x256xf32> to vector<256xf32>
    %78 = vector.shape_cast %77 : vector<256xf32> to vector<1x256xf32>
    %79 = math.sqrt %78 : vector<1x256xf32>
    %cst_33 = arith.constant -2.000000e-01 : f32
    %80 = vector.broadcast %cst_33 : f32 to vector<1x256xf32>
    %81 = arith.mulf %79, %80 : vector<1x256xf32>
    %82 = math.exp %81 : vector<1x256xf32>
    %cst_34 = arith.constant 1.000000e+00 : f32
    %83 = vector.broadcast %cst_34 : f32 to vector<1x256xf32>
    %84 = arith.select %10, %82, %83 : vector<1x256xf32>
    %85 = arith.mulf %64, %84 : vector<1x256xf32>
    %86 = vector.shape_cast %85 : vector<1x256xf32> to vector<1x1x256xf32>
    %cst_35 = arith.constant dense<0.000000e+00> : vector<1xf32>
    %87 = vector.multi_reduction <add>, %86, %cst_35 [1, 2] : vector<1x1x256xf32> to vector<1xf32>
    %88 = vector.shape_cast %87 : vector<1xf32> to vector<1x1x1xf32>
    %89 = vector.extract %88[0, 0, 0] : f32 from vector<1x1x1xf32>
    %90 = arith.addf %cst_15, %89 : f32
    %c1_i32 = arith.constant 1 : i32
    %cst_36 = arith.constant 6.000000e-01 : f32
    %91 = arith.mulf %cst_36, %90 : f32
    %cst_37 = arith.constant 4.000000e-01 : f32
    %92 = arith.mulf %cst_37, %73 : f32
    %93 = arith.addf %91, %92 : f32
    %94 = tpu.iota {dimensions = array<i32: 1>} : vector<1x128xi32>
    %cst_38 = arith.constant 0.000000e+00 : f32
    %95 = vector.broadcast %cst_38 : f32 to vector<1x128xf32>
    %c0_i32_39 = arith.constant 0 : i32
    %96 = vector.broadcast %c0_i32_39 : i32 to vector<1x128xi32>
    %97 = arith.cmpi eq, %94, %96 : vector<1x128xi32>
    %98 = vector.broadcast %93 : f32 to vector<1x128xf32>
    %99 = arith.select %97, %98, %95 : vector<1x128xi1>, vector<1x128xf32>
    %c1_i32_40 = arith.constant 1 : i32
    %100 = vector.broadcast %c1_i32_40 : i32 to vector<1x128xi32>
    %101 = arith.cmpi eq, %94, %100 : vector<1x128xi32>
    %102 = vector.broadcast %9 : f32 to vector<1x128xf32>
    %103 = arith.select %101, %102, %95 : vector<1x128xi1>, vector<1x128xf32>
    %104 = arith.addf %99, %103 : vector<1x128xf32>
    %c2_i32 = arith.constant 2 : i32
    %105 = vector.broadcast %c2_i32 : i32 to vector<1x128xi32>
    %106 = arith.cmpi eq, %94, %105 : vector<1x128xi32>
    %107 = vector.broadcast %23 : f32 to vector<1x128xf32>
    %108 = arith.select %106, %107, %95 : vector<1x128xi1>, vector<1x128xf32>
    %109 = arith.addf %104, %108 : vector<1x128xf32>
    %c3_i32 = arith.constant 3 : i32
    %110 = vector.broadcast %c3_i32 : i32 to vector<1x128xi32>
    %111 = arith.cmpi eq, %94, %110 : vector<1x128xi32>
    %112 = vector.broadcast %29 : f32 to vector<1x128xf32>
    %113 = arith.select %111, %112, %95 : vector<1x128xi1>, vector<1x128xf32>
    %114 = arith.addf %109, %113 : vector<1x128xf32>
    %c4_i32 = arith.constant 4 : i32
    %115 = vector.broadcast %c4_i32 : i32 to vector<1x128xi32>
    %116 = arith.cmpi eq, %94, %115 : vector<1x128xi32>
    %117 = vector.broadcast %34 : f32 to vector<1x128xf32>
    %118 = arith.select %116, %117, %95 : vector<1x128xi1>, vector<1x128xf32>
    %119 = arith.addf %114, %118 : vector<1x128xf32>
    %c0_41 = arith.constant 0 : index
    %c0_42 = arith.constant 0 : index
    %c0_43 = arith.constant 0 : index
    %120 = vector.load %arg6[%c0_41, %c0_42, %c0_43] : memref<1x1x128xf32, #tpu.memory_space<vmem>>, vector<1x1x128xf32>
    %121 = vector.shape_cast %120 : vector<1x1x128xf32> to vector<1x128xf32>
    %122 = vector.shape_cast %119 : vector<1x128xf32> to vector<1x1x128xf32>
    tpu.vector_store %arg6[%c0_41, %c0_42, %c0_43], %122 {strides = array<i32>} : memref<1x1x128xf32, #tpu.memory_space<vmem>>, vector<1x1x128xf32>,
    return
  }
  func.func @transform_0(%arg0: i32) -> (i32, i32, i32) {
    %c0_i32 = arith.constant 0 : i32
    %c0_i32_0 = arith.constant 0 : i32
    %c0_i32_1 = arith.constant 0 : i32
    return %arg0, %c0_i32, %c0_i32_0 : i32, i32, i32
  }
  func.func @transform_1(%arg0: i32) -> (i32, i32, i32) {
    %c0_i32 = arith.constant 0 : i32
    %c0_i32_0 = arith.constant 0 : i32
    %c0_i32_1 = arith.constant 0 : i32
    return %arg0, %c0_i32, %c0_i32_0 : i32, i32, i32
  }
  func.func @transform_2(%arg0: i32) -> (i32, i32, i32) {
    %c0_i32 = arith.constant 0 : i32
    %c0_i32_0 = arith.constant 0 : i32
    %c0_i32_1 = arith.constant 0 : i32
    return %arg0, %c0_i32, %c0_i32_0 : i32, i32, i32
  }
  func.func @transform_3(%arg0: i32) -> (i32, i32, i32) {
    %c0_i32 = arith.constant 0 : i32
    %c0_i32_0 = arith.constant 0 : i32
    %c0_i32_1 = arith.constant 0 : i32
    return %arg0, %c0_i32, %c0_i32_0 : i32, i32, i32
  }
  func.func @transform_4(%arg0: i32) -> (i32, i32) {
    %c0_i32 = arith.constant 0 : i32
    %c0_i32_0 = arith.constant 0 : i32
    %c0_i32_1 = arith.constant 0 : i32
    return %c0_i32, %c0_i32_0 : i32, i32
  }
  func.func @transform_5(%arg0: i32) -> (i32, i32, i32) {
    %c0_i32 = arith.constant 0 : i32
    %c0_i32_0 = arith.constant 0 : i32
    %c0_i32_1 = arith.constant 0 : i32
    return %arg0, %c0_i32, %c0_i32_0 : i32, i32, i32
  }
}

</mosaic_0001>

<bundles_post_ra>
// kernel: tpu_custom_call.1
= control target key start
LH: loop header
LB: loop body
LE: loop exit
PB: predicated region body
PF: predicated region fallthrough
CT: control target
= control target key end

     0   :  { %10 = vsyncpa [#allocation3], 0  ;;  %s1655_s0 = inlined_call_operand.vmem [shape: f32[2,6,256], index: 0, kind: input, shape index: {}]   ;;  %s1656_s1 = inlined_call_operand.vmem [shape: f32[2,6,256], index: 1, kind: input, shape index: {}]   ;;  %s1657_s2 = inlined_call_operand.vmem [shape: f32[2,1,256], index: 2, kind: input, shape index: {}]   ;;  %s1658_s3 = inlined_call_operand.vmem [shape: f32[2,24,8], index: 3, kind: input, shape index: {}]   ;;  %s1659_s4 = inlined_call_operand.vmem [shape: f32[8,256], index: 4, kind: input, shape index: {}]   ;;  %s1660_s5 = inlined_call_operand.hbm [shape: f32[2,1,128], index: 5, kind: output, shape index: {}]  }
   0x1   :  { %12 = vsyncpa [#allocation3 + $0x1], 0  ;;  %s1417_s18 = smov 0   ;;  %s1419_s19 = smov 0  }
   0x2   :  { %s1421_s20 = smov 0   ;;  %s1423_s21 = smov 0  }
   0x3 LB: > { %s1438_s22 = sadd.s32 4294967295, %s1382_s21   ;;  %s1205_s23 = sadd.s32 4294967294, %s1382_s21   ;;  %s1382_s21 = sphi %s1423_s21, %s1666_s21   ;;  %s1378_s20 = sphi %s1421_s20, %s1665_s20   ;;  %s1374_s19 = sphi %s1419_s19, %s1664_s19   ;;  %s1370_s18 = sphi %s1417_s18, %s1663_s18  }
   0x4   : > { %s1442_s24 = sadd.s32 1, %s1382_s21   ;;  %s150_s25 = sadd.s32 1, %s1378_s20 }
   0x5   : > { %s147_s26 = ssub.s32 %s1382_s21, %s1442_s24  ;;  %p160_p0 = scmp.ne.s32.totalorder %s1378_s20, %s1374_s19 }
   0x6   : > { %p148_p1 = scmp.eq.s32.totalorder %s147_s26, 0  ;;  %p161_p2 = scmp.eq.s32.totalorder %s1438_s22, 1 }
   0x7   : > { %p166_p3 = scmp.ne.s32.totalorder %s1374_s19, %s1370_s18  ;;  %p167_p4 = scmp.eq.s32.totalorder %s1205_s23, 1 }
   0x8   : > { %s1453_s27 = scalar_select %p148_p1, %s1378_s20, %s150_s25  }
   0x9   : > { %p1455_p5 = por %p161_p2, %p160_p0  ;;  %p1459_p6 = por %p167_p4, %p166_p3 }
   0xa   : > { %p1208_p7 = scmp.ge.s32.totalorder %s1382_s21, 1  ;;  %p219_p8 = scmp.lt.s32.totalorder %s1382_s21, 3 }
   0xc   : > { %p220_p9 = pnand %p1208_p7, %p219_p8 }
   0xd   : > { %v418_v0 = vld [vmem:[%s1659_s4 + $0x8] sm:$0xff] (!%p220_p9)  ;;  %v417_v1 = vld [vmem:[%s1659_s4] sm:$0xff] (!%p220_p9)  ;;  %p260_p10 = scmp.lt.s32.totalorder (!%p220_p9), %s1438_s22, 1  ;;  %v285_v2 = vlaneseq (!%p220_p9)  ;;  %v1384_v5 = vmov (!%p220_p9), 0.0   ;;  %vm419_vm0 = vcmask (!%p220_p9), 64512   ;;  %vm295_vm2 = vcmask (!%p220_p9), 1040384  }
   0xe   : > { %223 = sbr.rel (%p220_p9) target bundleno = 577 (0x241), region = 40  ;;  %v1472_v3 = vand.u32 (!%p220_p9), 4294901760, %v418_v0  ;;  %v1474_v4 = vand.u32 (!%p220_p9), 4294901760, %v417_v1  ;;  %784 = vmatprep.mubr.f32.mxu0 (!%p220_p9), %v1384_v5  ;;  %495 = vmatprep.mubr.f32.mxu1 (!%p220_p9), %v1384_v5  ;;  %vm319_vm3 = vcmask (!%p220_p9), 1042432   ;;  %s258_s25 = sand.u32 (!%p220_p9), 1, %s1374_s19  }
   0xf   : > { %v1482_v6 = vshrl.u32 (!%p220_p9), %v285_v2, 7 }
  0x10   : > { %719 = vmatprep.subr.mxu0 (!%p220_p9), %v1472_v3  ;;  %v1486_v7 = vsub.f32 (!%p220_p9), %v417_v1, %v1474_v4  ;;  %430 = vmatprep.subr.mxu1 (!%p220_p9), %v1472_v3  ;;  %v1490_v8 = vsub.f32 (!%p220_p9), %v418_v0, %v1472_v3 }
  0x11   : > { %721 = vmatpush1.msra.mxu0 (!%p220_p9), %v1474_v4  ;;  %432 = vmatpush1.msra.mxu1 (!%p220_p9), %v1474_v4  ;;  %v1503_v10 = vsub.s32 (!%p220_p9), 0, %v1482_v6  ;;  %v1510_v12 = vsub.s32 (!%p220_p9), 1, %v1482_v6 }
  0x12   : > { %v531_v9 = vand.u32 (!%p220_p9), 4294901760, %v1490_v8  ;;  %v537_v16 = vand.u32 (!%p220_p9), 4294901760, %v1486_v7 }
  0x14   : > { %v532_v15 = vsub.f32 (!%p220_p9), %v1490_v8, %v531_v9  ;;  %815 = vmatprep.subr.mxu0 (!%p220_p9), %v531_v9  ;;  %v538_v34 = vsub.f32 (!%p220_p9), %v1486_v7, %v537_v16 }
  0x15   : > { %s1479_s9 = scalar_select %p260_p10, %s1438_s22, 1 }
  0x16   : > { %v533_v25 = vand.u32 4294901760, %v532_v15  ;;  %v539_v50 = vand.u32 4294901760, %v538_v34 }
  0x17   : > { %s1254_s10 = smul.u32 24, %s1479_s9  ;;  %s1222_s11 = sshll.u32 %s1479_s9, 4 }
  0x18   : > { %s1500_s14 = scalar_lea.vmem %s1656_s1, %s1222_s11  ;;  %s1523_s26 = scalar_lea.vmem %s1655_s0, %s1222_s11  ;;  %534 = vmatprep.subr.mxu1 %v533_v25 }
  0x19   : > { %s278_s17 = scalar_lea.vmem %s1658_s3, %s1254_s10  ;;  %v1215_v11 = vld [vmem:[%s1500_s14 + $0x5] ss:$8 sm:$0x3]  ;;  %v311_v13 = vld [vmem:[%s1500_s14] sm:$0x1f]  ;;  %s1213_s30 = sshll.u32 %s1479_s9, 1 }
  0x1a   : > { %v368_v14 = vld [vmem:[%s278_s17] sm:$0xff]  ;;  %v369_v17 = vld [vmem:[%s278_s17 + $0x8] sm:$0xff]  ;;  %v370_v18 = vld [vmem:[%s278_s17 + $0x10] sm:$0xff]  ;;  %vm281_vm1 = vcmp.gt.f32.partialorder %v1215_v11, 0.5  ;;  %s273_s8 = scalar_lea.vmem %s1657_s2, %s1213_s30  ;;  %s259_s30 = scalar_lea.vmem [#allocation2], %s258_s25 }
  0x1b   : > { %v421_v19 = vsel %vm419_vm0, %v368_v14, 0  ;;  %v424_v20 = vsel %vm419_vm0, %v369_v17, 0  ;;  %v427_v21 = vsel %vm419_vm0, %v370_v18, 0  ;;  %v1216_v22 = vsel %vm281_vm1, 1.0, %v1384_v5  ;;  %v312_v23 = vld [vmem:[%s1500_s14 + $0x8] sm:$0x1f] }
  0x1c   : > { %v496_v24 = vand.u32 4294901760, %v421_v19  ;;  %v1525_v26 = vand.u32 4294901760, %v424_v20  ;;  %v309_v27 = vld [vmem:[%s1523_s26] sm:$0x1f]  ;;  %v1528_v28 = vand.u32 4294901760, %v427_v21  ;;  %v288_v29 = vrot.slane %v1216_v22, %v1503_v10  ;;  %s1114_s6 = sshll.u32 %s259_s30, 4  ;;  %s1615_s6 = int_to_ptr.vmem [resolvable:$true] %s1114_s6 }
  0x1d   : > { %v292_v30 = vrot.slane %v1216_v22, %v1510_v12  ;;  %v310_v31 = vld [vmem:[%s1523_s26 + $0x8] sm:$0x1f]  ;;  %v313_v32 = vsub.f32 %v309_v27, %v311_v13  ;;  %v1217_v55 = vld [vmem:[%s1523_s26 + $0x5] ss:$8 sm:$0x3]  ;;  %s1219_s26 = sshll.u32 %s1438_s22, 4 }
  0x1e   : > { %v497_v33 = vsub.f32 %v421_v19, %v496_v24  ;;  %v508_v35 = vsub.f32 %v424_v20, %v1525_v26  ;;  %v314_v36 = vsub.f32 %v310_v31, %v312_v23  ;;  %v519_v37 = vsub.f32 %v427_v21, %v1528_v28  ;;  %v1218_v14 = vld [vmem:[%s1500_s14 + $0x5] ss:$8 sm:$0x3]  ;;  %s1386_s22 = smov [#allocation2]  }
  0x1f   : > { %v296_v38 = vsel %vm295_vm2, %v288_v29, 0.0  ;;  %v297_v39 = vsel %vm295_vm2, %v292_v30, 0.0  ;;  %v1538_v40 = vmul.f32 %v313_v32, %v313_v32  ;;  %v377_v56 = vand.u32 2147483647, %v1217_v55 }
  0x20   : > { %v498_v41 = vand.u32 4294901760, %v497_v33  ;;  %v509_v42 = vand.u32 4294901760, %v508_v35  ;;  %v298_v43 = vadd.f32 %v297_v39, %v296_v38  ;;  %v1540_v44 = vmul.f32 %v314_v36, %v314_v36 }
  0x21   : > { %v1543_v45 = vmul.f32 %v1538_v40, %v288_v29  ;;  %v520_v48 = vand.u32 4294901760, %v519_v37  ;;  %v378_v57 = vsub.f32 0.0, %v377_v56  ;;  %v385_v21 = vmul.f32 2.0, %v1218_v14 }
  0x22   : > { %788 = vmatmul.mubr.f32.vlgmr.msra.gmra.mrb[0].mxu0 %v498_v41  ;;  %v499_v46 = vsub.f32 %v497_v33, %v498_v41  ;;  %v510_v47 = vsub.f32 %v508_v35, %v509_v42  ;;  %299 = vadd.xlane.f32.xlu0 %v298_v43  ;;  %v1546_v49 = vmul.f32 %v1540_v44, %v292_v30  ;;  %v353_v9 = vrot.slane %v1540_v44, 4 }
  0x23   : > { %793 = vmatprep.mubr.f32.mxu0 %v1384_v5  ;;  %819 = vmatpush1.msra.mxu0 %v537_v16  ;;  %v521_v53 = vsub.f32 %v519_v37, %v520_v48  ;;  %v379_v58 = vmul.f32 1.442695, %v378_v57  ;;  %v334_v19 = vrot.slane %v1543_v45, 3  ;;  %v387_v22 = vsub.f32 1.0, %v1218_v14 }
  0x24   : > { %v500_v51 = vand.u32 4294901760, %v499_v46  ;;  %905 = vmatprep.subr.mxu0 %v1472_v3  ;;  %v511_v52 = vand.u32 4294901760, %v510_v47  ;;  %v357_v16 = vsel %vm295_vm2, %v353_v9, 0.0  ;;  %v335_v20 = vrot.slane %v1546_v49, 3 }
  0x25   : > { %v522_v54 = vand.u32 4294901760, %v521_v53  ;;  %1308 = vpow2.f32 %v379_v58 }
  0x26   : > { %501 = vmatmul.mubr.f32.vlgmr.msra.gmra.mrb[0].mxu1 %v500_v51  ;;  %797 = vmatmul.mubr.f32.gmra.mrb[2].mxu0 %v509_v42  ;;  %v339_v25 = vsel %vm295_vm2, %v335_v20, 0.0 }
  0x27   : > { %540 = vmatpush1.msra.mxu1 %v539_v50  ;;  %506 = vmatprep.mubr.f32.mxu1 %v1384_v5 }
  0x28   : > { %802 = vmatprep.mubr.f32.mxu0 %v1384_v5  ;;  %627 = vmatprep.subr.mxu1 %v1490_v8  ;;  %v352_v8 = vrot.slane %v1538_v40, 4 }
  0x2a   : > { %512 = vmatmul.mubr.f32.gmra.mrb[2].mxu1 %v511_v52  ;;  %806 = vmatmul.mubr.f32.gmra.mrb[4].mxu0 %v520_v48  ;;  %v356_v15 = vsel %vm295_vm2, %v352_v8, 0.0 }
  0x2b   : > { %517 = vmatprep.mubr.f32.mxu1 %v1384_v5  ;;  %882 = vmatprep.mubr.f32.mxu0 %v1384_v5  ;;  %v358_v18 = vadd.f32 %v357_v16, %v356_v15 }
  0x2d   : > { %359 = vadd.xlane.f32.xlu1 %v358_v18 }
  0x2e   : > { %523 = vmatmul.mubr.f32.gmra.mrb[4].mxu1 %v522_v54  ;;  %884 = vmatmul.mubr.f32.vlgmr.msra.gmra.mrb[0].mxu0 %v496_v24 }
  0x2f   : > { %603 = vmatprep.mubr.f32.mxu1 %v1384_v5  ;;  %889 = vmatprep.mubr.f32.mxu0 %v1384_v5  ;;  %v1309_v61 = vpop.eup %1308 }
  0x30   : > { %907 = vmatpush1.msra.mxu0 %v1474_v4  ;;  %v381_v0 = vadd.f32 1.0, %v1309_v61 }
  0x32   : > { %605 = vmatmul.mubr.f32.vlgmr.msra.gmra.mrb[0].mxu1 %v496_v24  ;;  %891 = vmatmul.mubr.f32.gmra.mrb[2].mxu0 %v1525_v26  ;;  %1310 = vlog2.f32 %v381_v0 }
  0x33   : > { %630 = vmatpush1.msra.mxu1 %v1486_v7  ;;  %610 = vmatprep.mubr.f32.mxu1 %v1384_v5  ;;  %v375_v7 = vsub.f32 0.0, %v1217_v55 }
  0x34   : > { %896 = vmatprep.mubr.f32.mxu0 %v1384_v5 }
  0x35   : > { %v376_v11 = vmax.f32 %v375_v7, 0.0 }
  0x36   : > { %612 = vmatmul.mubr.f32.gmra.mrb[2].mxu1 %v1525_v26  ;;  %898 = vmatmul.mubr.f32.gmra.mrb[4].mxu0 %v1528_v28 }
  0x37   : > { %617 = vmatprep.mubr.f32.mxu1 %v1384_v5  ;;  %970 = vmatprep.mubr.f32.mxu0 %v1384_v5 }
  0x3a   : > { %619 = vmatmul.mubr.f32.gmra.mrb[4].mxu1 %v1528_v28  ;;  %972 = vmatmul.mubr.f32.vlgmr.msra.gmra.mrb[0].mxu0 %v496_v24  ;;  %v338_v24 = vsel %vm295_vm2, %v334_v19, 0.0 }
  0x3b   : > { %693 = vmatprep.mubr.f32.mxu1 %v1384_v5  ;;  %977 = vmatprep.mubr.f32.mxu0 %v1384_v5  ;;  %v340_v27 = vadd.f32 %v339_v25, %v338_v24 }
  0x3d   : > { %341 = vadd.xlane.f32.xlu1 %v340_v27 }
  0x3e   : > { %696 = vmatmul.mubr.f32.vlgmr.msra.gmra.mrb[0].mxu1 %v497_v33  ;;  %979 = vmatmul.mubr.f32.gmra.mrb[2].mxu0 %v1525_v26  ;;  %v320_v26 = vsel %vm319_vm3, %v1543_v45, 0.0  ;;  %v391_v33 = vld [vmem:[%s273_s8] sm:$0x3] }
  0x3f   : > { %701 = vmatprep.mubr.f32.mxu1 %v1384_v5  ;;  %984 = vmatprep.mubr.f32.mxu0 %v1384_v5 }
  0x42   : > { %704 = vmatmul.mubr.f32.gmra.mrb[2].mxu1 %v508_v35  ;;  %986 = vmatmul.mubr.f32.gmra.mrb[4].mxu0 %v1528_v28  ;;  %v321_v28 = vsel %vm319_vm3, %v1546_v49, 0.0 }
  0x43   : > { %709 = vmatprep.mubr.f32.mxu1 %v1384_v5  ;;  %v1311_v5 = vpop.eup %1310  ;;  %v322_v31 = vadd.f32 %v321_v28, %v320_v26  ;;  %v1385_v28 = vmov 1966171168  }
  0x44   : > { %v383_v13 = vmul.f32 0.6931472, %v1311_v5 }
  0x45   : > { %323 = vadd.xlane.f32.xlu0 %v322_v31 }
  0x46   : > { %712 = vmatmul.mubr.f32.gmra.mrb[4].mxu1 %v519_v37  ;;  %v384_v17 = vadd.f32 %v383_v13, %v376_v11 }
  0x48   : > { %v388_v23 = vadd.f32 %v1217_v55, %v384_v17  ;;  %v386_v29 = vmul.f32 %v385_v21, %v384_v17 }
  0x4a   : > { %v389_v30 = vmul.f32 %v388_v23, %v387_v22 }
  0x4c   : > { %v1590_v32 = vadd.f32 %v389_v30, %v386_v29  ;;  %v1037_v29 = vunpack.c.l.s4 %v1385_v28 }
  0x4e   : > { %v392_v34 = vmul.f32 %v391_v33, %v1590_v32  ;;  %v1038_v31 = vunpack.c.0.s8 %v1037_v29 }
  0x50   : > { %v397_v35 = vrot.slane %v392_v34, %v1503_v10  ;;  %v401_v36 = vrot.slane %v392_v34, %v1510_v12 }
  0x52   : > { %v404_v37 = vsel %vm295_vm2, %v397_v35, 0.0  ;;  %v405_v38 = vsel %vm295_vm2, %v401_v36, 0.0  ;;  %v1041_v36 = vsub.s32 %v1038_v31, %v1482_v6 }
  0x53   : > { %v406_v39 = vadd.f32 %v405_v38, %v404_v37 }
  0x55   : > { %407 = vadd.xlane.f32.xlu0 %v406_v39 }
  0xaf   : > { %v300_v59 = vpop.xlane.xlu0 %299 }
  0xb0   : > { %v301_v60 = vrot.slane %v300_v59, 4 }
  0xb2   : > { %v302_v62 = vadd.f32 %v301_v60, %v300_v59 }
  0xb4   : > { %v303_v63 = vrot.slane %v302_v62, 2 }
  0xb6   : > { %v304_v1 = vadd.f32 %v303_v63, %v302_v62 }
  0xb8   : > { %v305_v3 = vrot.slane %v304_v1, 1 }
  0xba   : > { %v306_v4 = vadd.f32 %v305_v3, %v304_v1 }
  0xbc   : > { %1255 = vpush %v306_v4 }
  0xed   : > { %s1597_s9 = spop %1255 }
  0xee   : > { %p308_p11 = scmp.gt.f32.partialorder %s1597_s9, 0.0 }
  0xf0   : > { %s1028_s10 = scalar_select %p308_p11, 1, 0 }
  0xf2   : > { %v1029_v30 = vstv %s1028_s10  ;;  %s1102_s10 = scalar_lea.sflag [#allocation3], %s258_s25 }
  0xf3   : > { %vm1030_vm8 = vcmp.eq.s32.totalorder %v1029_v30, 1 }
 0x10d   : > { %v973_v40 = vpop.f32.mrb[0].mxu0 }
 0x10e   : > { %v975_v41 = vpop.f32.mrb[1].mxu0 }
 0x111   : > { %v697_v42 = vpop.f32.mrb[0].mxu1  ;;  %v980_v43 = vpop.f32.mrb[2].mxu0 }
 0x112   : > { %v1224_v44 = vadd.f32 %v973_v40, %v697_v42  ;;  %v699_v45 = vpop.f32.mrb[1].mxu1  ;;  %v982_v46 = vpop.f32.mrb[3].mxu0 }
 0x113   : > { %v1225_v47 = vadd.f32 %v975_v41, %v699_v45 }
 0x115   : > { %v705_v48 = vpop.f32.mrb[2].mxu1  ;;  %v987_v49 = vpop.f32.mrb[4].mxu0 }
 0x116   : > { %v1226_v50 = vadd.f32 %v980_v43, %v705_v48  ;;  %v707_v51 = vpop.f32.mrb[3].mxu1  ;;  %v989_v52 = vpop.f32.mrb[5].mxu0 }
 0x117   : > { %v1227_v53 = vadd.f32 %v982_v46, %v707_v51 }
 0x119   : > { %v713_v54 = vpop.f32.mrb[4].mxu1 }
 0x11a   : > { %v1228_v55 = vadd.f32 %v987_v49, %v713_v54  ;;  %v715_v56 = vpop.f32.mrb[5].mxu1 }
 0x11b   : > { %v1229_v57 = vadd.f32 %v989_v52, %v715_v56  ;;  %v324_v52 = vpop.xlane.xlu0 %323 }
 0x11c   : > { %v992_v58 = vmin.f32 %v1224_v44, %v1228_v55  ;;  %v360_v44 = vpop.xlane.xlu1 %359 }
 0x11d   : > { %v1000_v59 = vmin.f32 %v1225_v47, %v1229_v57  ;;  %v361_v45 = vrot.slane %v360_v44, 4 }
 0x11e   : > { %v993_v60 = vmin.f32 %v992_v58, %v1226_v50 }
 0x11f   : > { %v1001_v61 = vmin.f32 %v1000_v59, %v1227_v53  ;;  %v362_v49 = vadd.f32 %v361_v45, %v360_v44  ;;  %v325_v53 = vrot.slane %v324_v52, 4  ;;  %v408_v59 = vpop.xlane.xlu0 %407 }
 0x120   : > { %v994_v62 = vrot.slane %v993_v60, 4  ;;  %v342_v50 = vpop.xlane.xlu1 %341 }
 0x121   : > { %v1002_v63 = vrot.slane %v1001_v61, 4  ;;  %v363_v6 = vrot.slane %v362_v49, 2  ;;  %v343_v51 = vrot.slane %v342_v50, 4 }
 0x122   : > { %v995_v0 = vmin.f32 %v993_v60, %v994_v62 }
 0x123   : > { %v1003_v1 = vmin.f32 %v1001_v61, %v1002_v63  ;;  %v344_v54 = vadd.f32 %v343_v51, %v342_v50  ;;  %v364_v55 = vadd.f32 %v363_v6, %v362_v49  ;;  %v409_v61 = vrot.slane %v408_v59, 4 }
 0x124   : > { %v996_v3 = vrot.slane %v995_v0, 2 }
 0x125   : > { %v1004_v4 = vrot.slane %v1003_v1, 2  ;;  %v365_v58 = vrot.slane %v364_v55, 1 }
 0x126   : > { %v997_v7 = vmin.f32 %v995_v0, %v996_v3  ;;  %v410_v0 = vadd.f32 %v409_v61, %v408_v59 }
 0x127   : > { %v1005_v5 = vmin.f32 %v1003_v1, %v1004_v4  ;;  %v366_v3 = vadd.f32 %v365_v58, %v364_v55 }
 0x128   : > { %v998_v8 = vrot.slane %v997_v7, 1  ;;  %v411_v4 = vrot.slane %v410_v0, 2 }
 0x129   : > { %v1006_v9 = vrot.slane %v1005_v5, 1 }
 0x12a   : > { %v999_v11 = vmin.f32 %v997_v7, %v998_v8  ;;  %v412_v7 = vadd.f32 %v411_v4, %v410_v0 }
 0x12b   : > { %v1007_v13 = vmin.f32 %v1005_v5, %v1006_v9 }
 0x12c   : > { %1312 = vrsqrt.f32 %v999_v11  ;;  %vm1010_vm4 = vcmp.eq.f32.partialorder %v999_v11, inf  ;;  %v1013_v17 = vand.u32 2147483648, %v999_v11  ;;  %vm1012_vm5 = vcmp.eq.f32.partialorder %v999_v11, 0.0 }
 0x12d   : > { %1314 = vrsqrt.f32 %v1007_v13  ;;  %vm1017_vm6 = vcmp.eq.f32.partialorder %v1007_v13, inf  ;;  %v1020_v20 = vand.u32 2147483648, %v1007_v13  ;;  %vm1019_vm7 = vcmp.eq.f32.partialorder %v1007_v13, 0.0 }
 0x12e   : > { %v413_v5 = vrot.slane %v412_v7, 1 }
 0x130   : > { %v414_v8 = vadd.f32 %v413_v5, %v412_v7 }
 0x136   : > { %v1313_v14 = vpop.eup %1312 }
 0x137   : > { %v1315_v15 = vpop.eup %1314  ;;  %v1009_v16 = vmul.f32 %v1313_v14, %v999_v11 }
 0x138   : > { %v1016_v18 = vmul.f32 %v1315_v15, %v1007_v13 }
 0x139   : > { %v1011_v19 = vsel %vm1010_vm4, %v999_v11, %v1009_v16 }
 0x13a   : > { %v1014_v21 = vsel %vm1012_vm5, %v1013_v17, %v1011_v19  ;;  %v1018_v22 = vsel %vm1017_vm6, %v1007_v13, %v1016_v18  ;;  %v1080_v18 = vand.u32 127, %v285_v2  ;;  %v1085_v19 = vstv %s1597_s9  ;;  %s1613_s9 = scalar_lea.hbm %s1660_s5, %s1219_s26 }
 0x13b   : > { %v1021_v23 = vsel %vm1019_vm7, %v1020_v20, %v1018_v22  ;;  %v1022_v24 = vmul.f32 -0.2, %v1014_v21 }
 0x13c   : > { %v1023_v25 = vmul.f32 -0.2, %v1021_v23  ;;  %vm1084_vm9 = vcmp.eq.s32.totalorder %v1080_v18, 1  ;;  %vm1081_vm10 = vcmp.eq.s32.totalorder %v1080_v18, 0  ;;  %vm1088_vm11 = vcmp.eq.s32.totalorder %v1080_v18, 2 }
 0x13d   : > { %v1024_v26 = vmul.f32 1.442695, %v1022_v24  ;;  %v1086_v22 = vsel %vm1084_vm9, %v1085_v19, 0.0  ;;  %vm1092_vm12 = vcmp.eq.s32.totalorder %v1080_v18, 3  ;;  %vm1096_vm13 = vcmp.eq.s32.totalorder %v1080_v18, 4 }
 0x13e   : > { %v1026_v27 = vmul.f32 1.442695, %v1023_v25 }
 0x13f   : > { %1316 = vpow2.f32 %v1024_v26 }
 0x140   : > { %1318 = vpow2.f32 %v1026_v27 }
 0x149   : > { %v1317_v33 = vpop.eup %1316 }
 0x14a   : > { %v1319_v34 = vpop.eup %1318  ;;  %v1031_v35 = vsel %vm1030_vm8, %v1317_v33, 1.0 }
 0x14b   : > { %v1032_v37 = vsel %vm1030_vm8, %v1319_v34, 1.0 }
 0x14c   : > { %v1035_v38 = vcombine.low %v1031_v35, %v1032_v37 }
 0x14e   : > { %v1042_v39 = vrot.slane %v1035_v38, %v1041_v36 }
 0x150   : > { %v1049_v40 = vrot.slane %v1042_v39, %v1041_v36 }
 0x152   : > { %v1051_v41 = vmul.f32 %v1049_v40, %v1590_v32  ;;  %v326_v32 = vadd.f32 %v325_v53, %v324_v52 }
 0x154   : > { %v1056_v42 = vrot.slane %v1051_v41, %v1503_v10  ;;  %v1060_v43 = vrot.slane %v1051_v41, %v1510_v12  ;;  %v345_v10 = vrot.slane %v344_v54, 2  ;;  %v327_v56 = vrot.slane %v326_v32, 2 }
 0x156   : > { %v1063_v46 = vsel %vm295_vm2, %v1056_v42, 0.0  ;;  %v1064_v47 = vsel %vm295_vm2, %v1060_v43, 0.0  ;;  %v346_v12 = vadd.f32 %v345_v10, %v344_v54  ;;  %v328_v57 = vadd.f32 %v327_v56, %v326_v32 }
 0x157   : > { %v1065_v48 = vadd.f32 %v1064_v47, %v1063_v46 }
 0x158   : > { %v347_v60 = vrot.slane %v346_v12, 1  ;;  %v329_v62 = vrot.slane %v328_v57, 1 }
 0x159   : > { %1066 = vadd.xlane.f32.xlu1 %v1065_v48 }
 0x15a   : > { %v348_v63 = vadd.f32 %v347_v60, %v346_v12  ;;  %v330_v1 = vadd.f32 %v329_v62, %v328_v57 }
 0x15c   : > { %1257 = vpush %v330_v1 }
 0x15d   : > { %1259 = vpush %v348_v63 }
 0x15e   : > { %1261 = vpush %v366_v3 }
 0x15f   : > { %1263 = vpush %v414_v8 }
 0x18d   : > { %s1258_s11 = spop %1257 }
 0x18e   : > { %s1260_s12 = spop %1259  ;;  %v1089_v20 = vstv %s1258_s11  ;;  %s1320_s11 = scalar_lea.vmem %s1615_s6, 16 }
 0x18f   : > { %s1262_s13 = spop %1261  ;;  %v1093_v24 = vstv %s1260_s12  ;;  %v1090_v26 = vsel %vm1088_vm11, %v1089_v20, 0.0  ;;  %p1321_p12 = scmp.ne.s32.totalorder %s1615_s6, %s1320_s11 }
 0x190   : > { %s1264_s14 = spop %1263  ;;  %v1097_v2 = vstv %s1262_s13  ;;  %v1094_v28 = vsel %vm1092_vm12, %v1093_v24, 0.0  ;;  %s1324_s12 = sshll.u32 %s1386_s22, 4  ;;  %s1325_s12 = int_to_ptr.vmem [resolvable:$false] %s1324_s12 }
 0x191   : > { %s1077_s15 = smul.f32 0.4, %s1264_s14  ;;  %v1098_v30 = vsel %vm1096_vm13, %v1097_v2, 0.0  ;;  %p1322_p13 = pnand %p1321_p12, %p1455_p5 }
 0x192   : > { %s1326_s13 = scalar_lea.vmem %s1325_s12, 32  ;;  %p1327_p1 = scmp.lt.s32.totalorder %s1615_s6, %s1325_s12 }
 0x193   : > { %p1323_p0 = pneg %p1322_p13  ;;  %p1328_p2 = scmp.lt.s32.totalorder %s1326_s13, %s1320_s11 }
 0x195   : > { %p1329_p3 = por %p1328_p2, %p1327_p1 }
 0x197   : > { %p1330_p4 = pnand %p1329_p3, %p1323_p0 }
 0x1e6   : > { %v1067_v9 = vpop.xlane.xlu1 %1066 }
 0x1e7   : > { %v1068_v11 = vrot.slane %v1067_v9, 4 }
 0x1e9   : > { %v1069_v13 = vadd.f32 %v1068_v11, %v1067_v9 }
 0x1eb   : > { %v1070_v14 = vrot.slane %v1069_v13, 2 }
 0x1ed   : > { %v1071_v15 = vadd.f32 %v1070_v14, %v1069_v13 }
 0x1ef   : > { %v1072_v16 = vrot.slane %v1071_v15, 1 }
 0x1f1   : > { %v1073_v17 = vadd.f32 %v1072_v16, %v1071_v15 }
 0x1f3   : > { %1265 = vpush %v1073_v17 }
 0x224   : > { %s1266_s16 = spop %1265 }
 0x225   : > { %s1076_s17 = smul.f32 0.6, %s1266_s16 }
 0x227   : > { %s1078_s23 = sadd.f32 %s1077_s15, %s1076_s17 }
 0x229   : > { %v1082_v21 = vstv %s1078_s23 }
 0x22a   : > { %v1083_v23 = vsel %vm1081_vm10, %v1082_v21, 0.0 }
 0x22b   : > { %v1087_v25 = vadd.f32 %v1086_v22, %v1083_v23 }
 0x22d   : > { %v1091_v27 = vadd.f32 %v1090_v26, %v1087_v25 }
 0x22f   : > { %v1095_v29 = vadd.f32 %v1094_v28, %v1091_v27 }
 0x231   : > { %v1099_v31 = vadd.f32 %v1098_v30, %v1095_v29 }
 0x233   : > { %1100 = vst [vmem:[%s259_s30] sm:$0x1] %v1099_v31 }
 0x234   : > { %1333 = shalt.err (!%p1330_p4)
}
 0x235   : > { %s1334_s14 = scalar_lea.hbm %s1613_s9, 16  ;;  %s1338_s17 = scalar_lea.hbm %s1660_s5, 32 }
 0x236   : > { %p1335_p7 = scmp.ne.s32.totalorder %s1613_s9, %s1334_s14  ;;  %p1339_p10 = scmp.lt.u32.totalorder %s1613_s9, %s1660_s5 }
 0x237   : > { %p1340_p11 = scmp.lt.u32.totalorder %s1338_s17, %s1334_s14  ;;  %p1342_p13 = scmp.lt.u32.totalorder %s1334_s14, %s1613_s9 }
 0x238   : > { %p1336_p8 = pnand %p1335_p7, %p1455_p5 }
 0x239   : > { %p1341_p12 = por %p1340_p11, %p1339_p10 }
 0x23a   : > { %p1337_p9 = pneg %p1336_p8 }
 0x23b   : > { %p1343_p0 = por %p1342_p13, %p1341_p12 }
 0x23d   : > { %p1344_p1 = pnand %p1343_p0, %p1337_p9 }
 0x23f   : > { %1347 = shalt.err (!%p1344_p1)
}
 0x240   : > { %1267 = dma.vmem_to_hbm [thread:$0]  (%p1455_p5), %s1615_s6, 16, %s1613_s9, %s1102_s10  }
 0x241 PF: > { %p1273_p2 = scmp.ge.s32.totalorder %s1382_s21, 2  ;;  %s1126_s26 = sand.u32 1, %s1370_s18  }
 0x242   : > { %s1127_s30 = scalar_lea.sflag [#allocation3], %s1126_s26 }
 0x243   : > { %p1270_p3 = pnand %p1273_p2, %p1459_p6 }
 0x245   : > { %1365 = dma.done.wait (!%p1270_p3), %s1127_s30, 16  }
 0x246   : > { %1367 = vsyncadd (!%p1270_p3), %s1127_s30, 4294967280  ;;  %p15_p4 = scmp.ge.s32.totalorder %s1442_s24, 4   ;;  %s1663_s18 = smov %s1374_s19 }
 0x247   : > { %s1664_s19 = smov %s1378_s20  ;;  %s1665_s20 = smov %s1453_s27 }
 0x248   : > { %s1666_s21 = smov %s1442_s24  ;;  %17 = sbr.rel (!%p15_p4) target bundleno = 3 (0x3), region = 87 }
 0x24f   :  { %1131 = vsyncpa [#allocation3], 1 }
 0x250   :  { %1133 = vsyncpa [#allocation3 + $0x1], 1 }

</bundles_post_ra>
